<compile_context>
chip_gen: v5e
topology: v5e:2x2
jax: 0.10.0
libtpu: 0.0.40
codegen_flags: <defaults>
</compile_context>

<pallas_src>
import math

import jax
import jax.numpy as jnp
from jax.experimental import pallas as pl
from jax.experimental.pallas import tpu as pltpu

# ---- config (small, deterministic) ----
B = 2          # batch
T = 8          # sequence length (== block_size)
C = 32         # n_embd
N_HEAD = 4
HEAD_DIM = C // N_HEAD
LN_EPS = 1e-5


def _layer_norm(v, g, b):
    # v: (R, C); g/b: (1, C)
    mu = jnp.mean(v, axis=-1, keepdims=True)
    var = jnp.mean((v - mu) * (v - mu), axis=-1, keepdims=True)
    return (v - mu) * jax.lax.rsqrt(var + LN_EPS) * g + b


def block_kernel(x_ref, vecs_ref, bqkv_ref, b1_ref,
                 wqkv_ref, wp_ref, w1_ref, w2_ref, o_ref):
    # x_ref: (R, C) rows with R = B*T (batch-major). All weights fully VMEM-resident.
    x = x_ref[...]                                   # (R, C) f32

    # packed small vectors: rows = [ln1_g, ln1_b, ln2_g, ln2_b, bp, b2]
    ln1_g = vecs_ref[0:1, :]
    ln1_b = vecs_ref[1:2, :]
    ln2_g = vecs_ref[2:3, :]
    ln2_b = vecs_ref[3:4, :]
    bp = vecs_ref[4:5, :]
    b2 = vecs_ref[5:6, :]

    # ---------------- attention branch ----------------
    h = _layer_norm(x, ln1_g, ln1_b)                 # (R, C) f32

    # fused QKV projection: one (R,C) @ (C,3C) matmul, bf16 in / f32 accumulate
    qkv = jnp.dot(h.astype(jnp.bfloat16), wqkv_ref[...],
                  preferred_element_type=jnp.float32) + bqkv_ref[...]   # (R, 3C) f32
    qkv_bf = qkv.astype(jnp.bfloat16)

    # Assemble all (batch, head) slabs into one batched (B*N_HEAD, T, HEAD_DIM) form.
    # Slices are static and row-tile aligned (multiples of T=8 sublanes); the per-head
    # compute below is two batched dot_generals, not a python loop of tiny matmuls.
    def slab(chunk, b, hd):
        r0 = b * T
        c0 = chunk * C + hd * HEAD_DIM
        return qkv_bf[r0:r0 + T, c0:c0 + HEAD_DIM]   # (T, HEAD_DIM) bf16

    q = jnp.stack([slab(0, b, hd) for b in range(B) for hd in range(N_HEAD)])
    k = jnp.stack([slab(1, b, hd) for b in range(B) for hd in range(N_HEAD)])
    v = jnp.stack([slab(2, b, hd) for b in range(B) for hd in range(N_HEAD)])
    # q/k/v: (BH, T, HEAD_DIM) bf16, BH = B * N_HEAD

    # hoisted additive causal bias (shared by every batch*head score tile);
    # -1e30 is NaN-safe because the diagonal is always unmasked.
    row = jax.lax.broadcasted_iota(jnp.int32, (T, T), 0)
    col = jax.lax.broadcasted_iota(jnp.int32, (T, T), 1)
    causal_bias = jnp.where(row >= col, 0.0, -1e30).astype(jnp.float32)

    scale = 1.0 / math.sqrt(HEAD_DIM)
    att = jnp.einsum('bqd,bkd->bqk', q, k,
                     preferred_element_type=jnp.float32) * scale        # (BH, T, T)
    att = att + causal_bias[None, :, :]
    att = jnp.exp(att - jnp.max(att, axis=-1, keepdims=True))
    att = att * pl.reciprocal(jnp.sum(att, axis=-1, keepdims=True), approx=True)

    y = jnp.einsum('bqk,bkd->bqd', att.astype(jnp.bfloat16), v,
                   preferred_element_type=jnp.float32)                  # (BH, T, HEAD_DIM)

    # merge back to (R, C) rows entirely in registers (no scratch, no masked stores):
    # lanes head-major within a row, rows batch-major — matches torch's
    # y.transpose(1, 2).reshape(B, T, C) followed by the wrapper's (B*T, C) fold.
    y_rows = jnp.concatenate(
        [jnp.concatenate([y[b * N_HEAD + hd] for hd in range(N_HEAD)], axis=-1)
         for b in range(B)],
        axis=0)                                                          # (R, C) f32

    x = x + jnp.dot(y_rows.astype(jnp.bfloat16), wp_ref[...],
                    preferred_element_type=jnp.float32) + bp             # residual 1

    # ---------------- MLP branch ----------------
    h2 = _layer_norm(x, ln2_g, ln2_b)                                    # (R, C)
    m = jnp.dot(h2.astype(jnp.bfloat16), w1_ref[...],
                preferred_element_type=jnp.float32) + b1_ref[...]        # (R, 4C)
    # exact GELU (erf) to match torch.nn.GELU default; the tanh approx would use the
    # EUP slot but changes numerics, so it is not applied here.
    m = 0.5 * m * (1.0 + jax.lax.erf(m * (1.0 / math.sqrt(2.0))))
    m = jnp.dot(m.astype(jnp.bfloat16), w2_ref[...],
                preferred_element_type=jnp.float32) + b2                 # (R, C)

    o_ref[...] = x + m                                                   # residual 2


def pack_params(p):
    """One-time packing: fuse QKV, pack small vectors, store matmul weights as bf16."""
    return {
        "vecs": jnp.concatenate([p["ln1_g"], p["ln1_b"], p["ln2_g"], p["ln2_b"],
                                 p["bp"], p["b2"]], axis=0),                  # (6, C) f32
        "b_qkv": jnp.concatenate([p["bq"], p["bk"], p["bv"]], axis=-1),       # (1, 3C) f32
        "b1": p["b1"],                                                        # (1, 4C) f32
        "w_qkv": jnp.concatenate([p["wq"], p["wk"], p["wv"]],
                                 axis=-1).astype(jnp.bfloat16),               # (C, 3C) bf16
        "wp": p["wp"].astype(jnp.bfloat16),                                   # (C, C)  bf16
        "w1": p["w1"].astype(jnp.bfloat16),                                   # (C, 4C) bf16
        "w2": p["w2"].astype(jnp.bfloat16),                                   # (4C, C) bf16
    }


def block_forward(x, pk):
    """x: (B, T, C) float32; pk: packed params from pack_params()."""
    Bsz, Tsz, Csz = x.shape
    R = Bsz * Tsz
    x2 = x.reshape(R, Csz)   # fold batch/time: row-wise matmuls see 16 sublanes

    args = [x2, pk["vecs"], pk["b_qkv"], pk["b1"],
            pk["w_qkv"], pk["wp"], pk["w1"], pk["w2"]]

    def full_spec(shape):
        nd = len(shape)
        return pl.BlockSpec(shape, lambda i, _nd=nd: (0,) * _nd)

    out2 = pl.pallas_call(
        block_kernel,
        out_shape=jax.ShapeDtypeStruct((R, Csz), jnp.float32),
        grid_spec=pltpu.PrefetchScalarGridSpec(
            num_scalar_prefetch=0,
            grid=(1,),                                   # single step: whole problem in VMEM
            in_specs=[full_spec(a.shape) for a in args],
            out_specs=pl.BlockSpec((R, Csz), lambda i: (0, 0)),
        ),
        compiler_params=pltpu.CompilerParams(
            dimension_semantics=("arbitrary",)),         # no megacore split at this size
    )(*args)
    return out2.reshape(Bsz, Tsz, Csz)


def init_params(key):
    ks = jax.random.split(key, 8)
    std = 0.02
    return {
        # LayerNorm 1 / 2: gamma=1, beta=0 (torch default init), kept as (1, C)
        "ln1_g": jnp.ones((1, C), jnp.float32),
        "ln1_b": jnp.zeros((1, C), jnp.float32),
        "ln2_g": jnp.ones((1, C), jnp.float32),
        "ln2_b": jnp.zeros((1, C), jnp.float32),
        # attention linears, stored (in, out)
        "wq": std * jax.random.normal(ks[0], (C, C), jnp.float32),
        "bq": jnp.zeros((1, C), jnp.float32),
        "wk": std * jax.random.normal(ks[1], (C, C), jnp.float32),
        "bk": jnp.zeros((1, C), jnp.float32),
        "wv": std * jax.random.normal(ks[2], (C, C), jnp.float32),
        "bv": jnp.zeros((1, C), jnp.float32),
        "wp": std * jax.random.normal(ks[3], (C, C), jnp.float32),
        "bp": jnp.zeros((1, C), jnp.float32),
        # MLP linears
        "w1": std * jax.random.normal(ks[4], (C, 4 * C), jnp.float32),
        "b1": jnp.zeros((1, 4 * C), jnp.float32),
        "w2": std * jax.random.normal(ks[5], (4 * C, C), jnp.float32),
        "b2": jnp.zeros((1, C), jnp.float32),
    }


def reference_forward(x, p):
    """Pure-JAX f32 reference mirroring the PyTorch Block forward (eval mode)."""
    hi = jax.lax.Precision.HIGHEST

    def ln(v, g, b):
        mu = jnp.mean(v, axis=-1, keepdims=True)
        var = jnp.mean((v - mu) ** 2, axis=-1, keepdims=True)
        return (v - mu) * jax.lax.rsqrt(var + LN_EPS) * g + b

    Bsz, Tsz, Csz = x.shape
    h = ln(x, p["ln1_g"], p["ln1_b"])
    q = jnp.dot(h, p["wq"], precision=hi) + p["bq"]
    k = jnp.dot(h, p["wk"], precision=hi) + p["bk"]
    v = jnp.dot(h, p["wv"], precision=hi) + p["bv"]
    q = q.reshape(Bsz, Tsz, N_HEAD, HEAD_DIM).transpose(0, 2, 1, 3)
    k = k.reshape(Bsz, Tsz, N_HEAD, HEAD_DIM).transpose(0, 2, 1, 3)
    v = v.reshape(Bsz, Tsz, N_HEAD, HEAD_DIM).transpose(0, 2, 1, 3)
    att = jnp.einsum("bhtd,bhsd->bhts", q, k, precision=hi) / math.sqrt(HEAD_DIM)
    mask = jnp.tril(jnp.ones((Tsz, Tsz), bool))
    att = jnp.where(mask[None, None], att, -jnp.inf)
    att = jax.nn.softmax(att, axis=-1)
    y = jnp.einsum("bhts,bhsd->bhtd", att, v, precision=hi)
    y = y.transpose(0, 2, 1, 3).reshape(Bsz, Tsz, Csz)
    x = x + (jnp.dot(y, p["wp"], precision=hi) + p["bp"])
    h2 = ln(x, p["ln2_g"], p["ln2_b"])
    m = jnp.dot(h2, p["w1"], precision=hi) + p["b1"]
    m = 0.5 * m * (1.0 + jax.lax.erf(m / math.sqrt(2.0)))
    m = jnp.dot(m, p["w2"], precision=hi) + p["b2"]
    return x + m


if __name__ == "__main__":
    key = jax.random.PRNGKey(0)
    k_x, k_p = jax.random.split(key)
    x = jax.random.normal(k_x, (B, T, C), jnp.float32)
    params = init_params(k_p)
    packed = pack_params(params)

    out = block_forward(x, packed)
    out = jax.block_until_ready(out)

    ref = reference_forward(x, params)
    assert out.shape == (B, T, C)
    max_err = jnp.max(jnp.abs(out - ref))
    # tolerance accounts for bf16 matmul operands (f32 accumulation) + approx reciprocal
    assert jnp.allclose(out, ref, rtol=5e-3, atol=5e-3), f"max abs err {max_err}"

    print("KERNEL_OK")
</pallas_src>

<mosaic_0001>
module attributes {stable_mosaic.version = 11 : i64} {
  func.func @block_kernel(%arg0: i32, %arg1: memref<16x32xf32, #tpu.memory_space<vmem>>, %arg2: memref<6x32xf32, #tpu.memory_space<vmem>>, %arg3: memref<1x96xf32, #tpu.memory_space<vmem>>, %arg4: memref<1x128xf32, #tpu.memory_space<vmem>>, %arg5: memref<32x96xbf16, #tpu.memory_space<vmem>>, %arg6: memref<32x32xbf16, #tpu.memory_space<vmem>>, %arg7: memref<32x128xbf16, #tpu.memory_space<vmem>>, %arg8: memref<128x32xbf16, #tpu.memory_space<vmem>>, %arg9: memref<16x32xf32, #tpu.memory_space<vmem>>) attributes {dimension_semantics = [#tpu.dimension_semantics<arbitrary>], iteration_bounds = array<i64: 1>, scalar_prefetch = 0 : i64, scratch_operands = 0 : i64, tpu.core_type = #tpu.core_type<tc>, window_params = [{pipeline_mode = #tpu.pipeline_mode<synchronous>, transform_indices = @transform_0, window_bounds = array<i64: 16, 32>}, {pipeline_mode = #tpu.pipeline_mode<synchronous>, transform_indices = @transform_1, window_bounds = array<i64: 6, 32>}, {pipeline_mode = #tpu.pipeline_mode<synchronous>, transform_indices = @transform_2, window_bounds = array<i64: 1, 96>}, {pipeline_mode = #tpu.pipeline_mode<synchronous>, transform_indices = @transform_3, window_bounds = array<i64: 1, 128>}, {pipeline_mode = #tpu.pipeline_mode<synchronous>, transform_indices = @transform_4, window_bounds = array<i64: 32, 96>}, {pipeline_mode = #tpu.pipeline_mode<synchronous>, transform_indices = @transform_5, window_bounds = array<i64: 32, 32>}, {pipeline_mode = #tpu.pipeline_mode<synchronous>, transform_indices = @transform_6, window_bounds = array<i64: 32, 128>}, {pipeline_mode = #tpu.pipeline_mode<synchronous>, transform_indices = @transform_7, window_bounds = array<i64: 128, 32>}, {pipeline_mode = #tpu.pipeline_mode<synchronous>, transform_indices = @transform_8, window_bounds = array<i64: 16, 32>}]} {
    %c0 = arith.constant 0 : index
    %c0_0 = arith.constant 0 : index
    %0 = vector.load %arg1[%c0, %c0_0] : memref<16x32xf32, #tpu.memory_space<vmem>>, vector<16x32xf32>
    %c0_1 = arith.constant 0 : index
    %c0_2 = arith.constant 0 : index
    %1 = vector.load %arg2[%c0_1, %c0_2] : memref<6x32xf32, #tpu.memory_space<vmem>>, vector<1x32xf32>
    %c1 = arith.constant 1 : index
    %c0_3 = arith.constant 0 : index
    %2 = vector.load %arg2[%c1, %c0_3] : memref<6x32xf32, #tpu.memory_space<vmem>>, vector<1x32xf32>
    %c2 = arith.constant 2 : index
    %c0_4 = arith.constant 0 : index
    %3 = vector.load %arg2[%c2, %c0_4] : memref<6x32xf32, #tpu.memory_space<vmem>>, vector<1x32xf32>
    %c3 = arith.constant 3 : index
    %c0_5 = arith.constant 0 : index
    %4 = vector.load %arg2[%c3, %c0_5] : memref<6x32xf32, #tpu.memory_space<vmem>>, vector<1x32xf32>
    %c4 = arith.constant 4 : index
    %c0_6 = arith.constant 0 : index
    %5 = vector.load %arg2[%c4, %c0_6] : memref<6x32xf32, #tpu.memory_space<vmem>>, vector<1x32xf32>
    %c5 = arith.constant 5 : index
    %c0_7 = arith.constant 0 : index
    %6 = vector.load %arg2[%c5, %c0_7] : memref<6x32xf32, #tpu.memory_space<vmem>>, vector<1x32xf32>
    %cst = arith.constant dense<0.000000e+00> : vector<16xf32>
    %7 = vector.multi_reduction <add>, %0, %cst [1] : vector<16x32xf32> to vector<16xf32>
    %8 = vector.shape_cast %7 : vector<16xf32> to vector<16x1xf32>
    %cst_8 = arith.constant 3.200000e+01 : f32
    %9 = vector.broadcast %cst_8 : f32 to vector<16x1xf32>
    %10 = arith.divf %8, %9 : vector<16x1xf32>
    %11 = vector.broadcast %10 : vector<16x1xf32> to vector<16x32xf32>
    %12 = arith.subf %0, %11 : vector<16x32xf32>
    %13 = vector.broadcast %10 : vector<16x1xf32> to vector<16x32xf32>
    %14 = arith.subf %0, %13 : vector<16x32xf32>
    %15 = arith.mulf %12, %14 : vector<16x32xf32>
    %cst_9 = arith.constant dense<0.000000e+00> : vector<16xf32>
    %16 = vector.multi_reduction <add>, %15, %cst_9 [1] : vector<16x32xf32> to vector<16xf32>
    %17 = vector.shape_cast %16 : vector<16xf32> to vector<16x1xf32>
    %cst_10 = arith.constant 3.200000e+01 : f32
    %18 = vector.broadcast %cst_10 : f32 to vector<16x1xf32>
    %19 = arith.divf %17, %18 : vector<16x1xf32>
    %20 = vector.broadcast %10 : vector<16x1xf32> to vector<16x32xf32>
    %21 = arith.subf %0, %20 : vector<16x32xf32>
    %cst_11 = arith.constant 9.99999974E-6 : f32
    %22 = vector.broadcast %cst_11 : f32 to vector<16x1xf32>
    %23 = arith.addf %19, %22 : vector<16x1xf32>
    %24 = math.rsqrt %23 : vector<16x1xf32>
    %25 = vector.broadcast %24 : vector<16x1xf32> to vector<16x32xf32>
    %26 = arith.mulf %21, %25 : vector<16x32xf32>
    %27 = vector.broadcast %1 : vector<1x32xf32> to vector<16x32xf32>
    %28 = arith.mulf %26, %27 : vector<16x32xf32>
    %29 = vector.broadcast %2 : vector<1x32xf32> to vector<16x32xf32>
    %30 = arith.addf %28, %29 : vector<16x32xf32>
    %31 = arith.truncf %30 : vector<16x32xf32> to vector<16x32xbf16>
    %c0_12 = arith.constant 0 : index
    %c0_13 = arith.constant 0 : index
    %32 = vector.load %arg5[%c0_12, %c0_13] : memref<32x96xbf16, #tpu.memory_space<vmem>>, vector<32x96xbf16>
    %cst_14 = arith.constant dense<0.000000e+00> : vector<16x96xf32>
    %33 = tpu.matmul %31, %32, %cst_14 {dimension_numbers = #tpu.dot_dimension_numbers<[1], [0], [0], [1], [0, 0, 1, 1], [], []>} : vector<16x32xbf16>, vector<32x96xbf16>, vector<16x96xf32> -> vector<16x96xf32>
    %c0_15 = arith.constant 0 : index
    %c0_16 = arith.constant 0 : index
    %34 = vector.load %arg3[%c0_15, %c0_16] : memref<1x96xf32, #tpu.memory_space<vmem>>, vector<1x96xf32>
    %35 = vector.broadcast %34 : vector<1x96xf32> to vector<16x96xf32>
    %36 = arith.addf %33, %35 : vector<16x96xf32>
    %37 = arith.truncf %36 : vector<16x96xf32> to vector<16x96xbf16>
    %38 = vector.extract_strided_slice %37 {offsets = [0, 0], sizes = [8, 8], strides = [1, 1]} : vector<16x96xbf16> to vector<8x8xbf16>
    %39 = vector.extract_strided_slice %37 {offsets = [0, 8], sizes = [8, 8], strides = [1, 1]} : vector<16x96xbf16> to vector<8x8xbf16>
    %40 = vector.extract_strided_slice %37 {offsets = [0, 16], sizes = [8, 8], strides = [1, 1]} : vector<16x96xbf16> to vector<8x8xbf16>
    %41 = vector.extract_strided_slice %37 {offsets = [0, 24], sizes = [8, 8], strides = [1, 1]} : vector<16x96xbf16> to vector<8x8xbf16>
    %42 = vector.extract_strided_slice %37 {offsets = [8, 0], sizes = [8, 8], strides = [1, 1]} : vector<16x96xbf16> to vector<8x8xbf16>
    %43 = vector.extract_strided_slice %37 {offsets = [8, 8], sizes = [8, 8], strides = [1, 1]} : vector<16x96xbf16> to vector<8x8xbf16>
    %44 = vector.extract_strided_slice %37 {offsets = [8, 16], sizes = [8, 8], strides = [1, 1]} : vector<16x96xbf16> to vector<8x8xbf16>
    %45 = vector.extract_strided_slice %37 {offsets = [8, 24], sizes = [8, 8], strides = [1, 1]} : vector<16x96xbf16> to vector<8x8xbf16>
    %46 = vector.shape_cast %38 : vector<8x8xbf16> to vector<1x8x8xbf16>
    %47 = vector.shape_cast %39 : vector<8x8xbf16> to vector<1x8x8xbf16>
    %48 = vector.shape_cast %40 : vector<8x8xbf16> to vector<1x8x8xbf16>
    %49 = vector.shape_cast %41 : vector<8x8xbf16> to vector<1x8x8xbf16>
    %50 = vector.shape_cast %42 : vector<8x8xbf16> to vector<1x8x8xbf16>
    %51 = vector.shape_cast %43 : vector<8x8xbf16> to vector<1x8x8xbf16>
    %52 = vector.shape_cast %44 : vector<8x8xbf16> to vector<1x8x8xbf16>
    %53 = vector.shape_cast %45 : vector<8x8xbf16> to vector<1x8x8xbf16>
    %54 = tpu.concatenate %46, %47, %48, %49, %50, %51, %52, %53 in 0 : vector<1x8x8xbf16>, vector<1x8x8xbf16>, vector<1x8x8xbf16>, vector<1x8x8xbf16>, vector<1x8x8xbf16>, vector<1x8x8xbf16>, vector<1x8x8xbf16>, vector<1x8x8xbf16> -> vector<8x8x8xbf16>
    %55 = vector.extract_strided_slice %37 {offsets = [0, 32], sizes = [8, 8], strides = [1, 1]} : vector<16x96xbf16> to vector<8x8xbf16>
    %56 = vector.extract_strided_slice %37 {offsets = [0, 40], sizes = [8, 8], strides = [1, 1]} : vector<16x96xbf16> to vector<8x8xbf16>
    %57 = vector.extract_strided_slice %37 {offsets = [0, 48], sizes = [8, 8], strides = [1, 1]} : vector<16x96xbf16> to vector<8x8xbf16>
    %58 = vector.extract_strided_slice %37 {offsets = [0, 56], sizes = [8, 8], strides = [1, 1]} : vector<16x96xbf16> to vector<8x8xbf16>
    %59 = vector.extract_strided_slice %37 {offsets = [8, 32], sizes = [8, 8], strides = [1, 1]} : vector<16x96xbf16> to vector<8x8xbf16>
    %60 = vector.extract_strided_slice %37 {offsets = [8, 40], sizes = [8, 8], strides = [1, 1]} : vector<16x96xbf16> to vector<8x8xbf16>
    %61 = vector.extract_strided_slice %37 {offsets = [8, 48], sizes = [8, 8], strides = [1, 1]} : vector<16x96xbf16> to vector<8x8xbf16>
    %62 = vector.extract_strided_slice %37 {offsets = [8, 56], sizes = [8, 8], strides = [1, 1]} : vector<16x96xbf16> to vector<8x8xbf16>
    %63 = vector.shape_cast %55 : vector<8x8xbf16> to vector<1x8x8xbf16>
    %64 = vector.shape_cast %56 : vector<8x8xbf16> to vector<1x8x8xbf16>
    %65 = vector.shape_cast %57 : vector<8x8xbf16> to vector<1x8x8xbf16>
    %66 = vector.shape_cast %58 : vector<8x8xbf16> to vector<1x8x8xbf16>
    %67 = vector.shape_cast %59 : vector<8x8xbf16> to vector<1x8x8xbf16>
    %68 = vector.shape_cast %60 : vector<8x8xbf16> to vector<1x8x8xbf16>
    %69 = vector.shape_cast %61 : vector<8x8xbf16> to vector<1x8x8xbf16>
    %70 = vector.shape_cast %62 : vector<8x8xbf16> to vector<1x8x8xbf16>
    %71 = tpu.concatenate %63, %64, %65, %66, %67, %68, %69, %70 in 0 : vector<1x8x8xbf16>, vector<1x8x8xbf16>, vector<1x8x8xbf16>, vector<1x8x8xbf16>, vector<1x8x8xbf16>, vector<1x8x8xbf16>, vector<1x8x8xbf16>, vector<1x8x8xbf16> -> vector<8x8x8xbf16>
    %72 = vector.extract_strided_slice %37 {offsets = [0, 64], sizes = [8, 8], strides = [1, 1]} : vector<16x96xbf16> to vector<8x8xbf16>
    %73 = vector.extract_strided_slice %37 {offsets = [0, 72], sizes = [8, 8], strides = [1, 1]} : vector<16x96xbf16> to vector<8x8xbf16>
    %74 = vector.extract_strided_slice %37 {offsets = [0, 80], sizes = [8, 8], strides = [1, 1]} : vector<16x96xbf16> to vector<8x8xbf16>
    %75 = vector.extract_strided_slice %37 {offsets = [0, 88], sizes = [8, 8], strides = [1, 1]} : vector<16x96xbf16> to vector<8x8xbf16>
    %76 = vector.extract_strided_slice %37 {offsets = [8, 64], sizes = [8, 8], strides = [1, 1]} : vector<16x96xbf16> to vector<8x8xbf16>
    %77 = vector.extract_strided_slice %37 {offsets = [8, 72], sizes = [8, 8], strides = [1, 1]} : vector<16x96xbf16> to vector<8x8xbf16>
    %78 = vector.extract_strided_slice %37 {offsets = [8, 80], sizes = [8, 8], strides = [1, 1]} : vector<16x96xbf16> to vector<8x8xbf16>
    %79 = vector.extract_strided_slice %37 {offsets = [8, 88], sizes = [8, 8], strides = [1, 1]} : vector<16x96xbf16> to vector<8x8xbf16>
    %80 = vector.shape_cast %72 : vector<8x8xbf16> to vector<1x8x8xbf16>
    %81 = vector.shape_cast %73 : vector<8x8xbf16> to vector<1x8x8xbf16>
    %82 = vector.shape_cast %74 : vector<8x8xbf16> to vector<1x8x8xbf16>
    %83 = vector.shape_cast %75 : vector<8x8xbf16> to vector<1x8x8xbf16>
    %84 = vector.shape_cast %76 : vector<8x8xbf16> to vector<1x8x8xbf16>
    %85 = vector.shape_cast %77 : vector<8x8xbf16> to vector<1x8x8xbf16>
    %86 = vector.shape_cast %78 : vector<8x8xbf16> to vector<1x8x8xbf16>
    %87 = vector.shape_cast %79 : vector<8x8xbf16> to vector<1x8x8xbf16>
    %88 = tpu.concatenate %80, %81, %82, %83, %84, %85, %86, %87 in 0 : vector<1x8x8xbf16>, vector<1x8x8xbf16>, vector<1x8x8xbf16>, vector<1x8x8xbf16>, vector<1x8x8xbf16>, vector<1x8x8xbf16>, vector<1x8x8xbf16>, vector<1x8x8xbf16> -> vector<8x8x8xbf16>
    %89 = tpu.iota {dimensions = array<i32: 0>} : vector<8x8xi32>
    %90 = tpu.iota {dimensions = array<i32: 1>} : vector<8x8xi32>
    %91 = arith.cmpi sge, %89, %90 : vector<8x8xi32>
    %cst_17 = arith.constant 0.000000e+00 : f32
    %cst_18 = arith.constant -1.000000e+30 : f32
    %92 = vector.broadcast %cst_17 : f32 to vector<8x8xf32>
    %93 = vector.broadcast %cst_18 : f32 to vector<8x8xf32>
    %94 = arith.select %91, %92, %93 : vector<8x8xi1>, vector<8x8xf32>
    "tpu.trace_start"() <{level = 10 : i32, message = "bqd,bkd->bqk"}> : () -> ()
    %cst_19 = arith.constant dense<0.000000e+00> : vector<8x8x8xf32>
    %95 = tpu.matmul %54, %71, %cst_19 {dimension_numbers = #tpu.dot_dimension_numbers<[2], [2], [1], [1], [0, 0, 0, 1, 1, 1], [0], [0]>} : vector<8x8x8xbf16>, vector<8x8x8xbf16>, vector<8x8x8xf32> -> vector<8x8x8xf32>
    "tpu.trace_stop"() : () -> ()
    %cst_20 = arith.constant 0.353553385 : f32
    %96 = vector.broadcast %cst_20 : f32 to vector<8x8x8xf32>
    %97 = arith.mulf %95, %96 : vector<8x8x8xf32>
    %98 = vector.shape_cast %94 : vector<8x8xf32> to vector<1x8x8xf32>
    %99 = vector.broadcast %98 : vector<1x8x8xf32> to vector<8x8x8xf32>
    %100 = arith.addf %97, %99 : vector<8x8x8xf32>
    %cst_21 = arith.constant dense<0xFF800000> : vector<8x8xf32>
    %101 = vector.multi_reduction <maximumf>, %100, %cst_21 [2] : vector<8x8x8xf32> to vector<8x8xf32>
    %102 = vector.shape_cast %101 : vector<8x8xf32> to vector<8x8x1xf32>
    %103 = vector.broadcast %102 : vector<8x8x1xf32> to vector<8x8x8xf32>
    %104 = arith.subf %100, %103 : vector<8x8x8xf32>
    %105 = math.exp %104 : vector<8x8x8xf32>
    %cst_22 = arith.constant dense<0.000000e+00> : vector<8x8xf32>
    %106 = vector.multi_reduction <add>, %105, %cst_22 [2] : vector<8x8x8xf32> to vector<8x8xf32>
    %107 = vector.shape_cast %106 : vector<8x8xf32> to vector<8x8x1xf32>
    %108 = tpu.reciprocal %107 {approx = true} : vector<8x8x1xf32> -> vector<8x8x1xf32>
    %109 = vector.broadcast %108 : vector<8x8x1xf32> to vector<8x8x8xf32>
    %110 = arith.mulf %105, %109 : vector<8x8x8xf32>
    %111 = arith.truncf %110 : vector<8x8x8xf32> to vector<8x8x8xbf16>
    "tpu.trace_start"() <{level = 10 : i32, message = "bqk,bkd->bqd"}> : () -> ()
    %cst_23 = arith.constant dense<0.000000e+00> : vector<8x8x8xf32>
    %112 = tpu.matmul %111, %88, %cst_23 {dimension_numbers = #tpu.dot_dimension_numbers<[2], [1], [1], [2], [0, 0, 0, 1, 1, 2], [0], [0]>} : vector<8x8x8xbf16>, vector<8x8x8xbf16>, vector<8x8x8xf32> -> vector<8x8x8xf32>
    "tpu.trace_stop"() : () -> ()
    %113 = vector.extract_strided_slice %112 {offsets = [0, 0, 0], sizes = [1, 8, 8], strides = [1, 1, 1]} : vector<8x8x8xf32> to vector<1x8x8xf32>
    %114 = vector.shape_cast %113 : vector<1x8x8xf32> to vector<8x8xf32>
    %115 = vector.extract_strided_slice %112 {offsets = [1, 0, 0], sizes = [1, 8, 8], strides = [1, 1, 1]} : vector<8x8x8xf32> to vector<1x8x8xf32>
    %116 = vector.shape_cast %115 : vector<1x8x8xf32> to vector<8x8xf32>
    %117 = vector.extract_strided_slice %112 {offsets = [2, 0, 0], sizes = [1, 8, 8], strides = [1, 1, 1]} : vector<8x8x8xf32> to vector<1x8x8xf32>
    %118 = vector.shape_cast %117 : vector<1x8x8xf32> to vector<8x8xf32>
    %119 = vector.extract_strided_slice %112 {offsets = [3, 0, 0], sizes = [1, 8, 8], strides = [1, 1, 1]} : vector<8x8x8xf32> to vector<1x8x8xf32>
    %120 = vector.shape_cast %119 : vector<1x8x8xf32> to vector<8x8xf32>
    %121 = tpu.concatenate %114, %116, %118, %120 in 1 : vector<8x8xf32>, vector<8x8xf32>, vector<8x8xf32>, vector<8x8xf32> -> vector<8x32xf32>
    %122 = vector.extract_strided_slice %112 {offsets = [4, 0, 0], sizes = [1, 8, 8], strides = [1, 1, 1]} : vector<8x8x8xf32> to vector<1x8x8xf32>
    %123 = vector.shape_cast %122 : vector<1x8x8xf32> to vector<8x8xf32>
    %124 = vector.extract_strided_slice %112 {offsets = [5, 0, 0], sizes = [1, 8, 8], strides = [1, 1, 1]} : vector<8x8x8xf32> to vector<1x8x8xf32>
    %125 = vector.shape_cast %124 : vector<1x8x8xf32> to vector<8x8xf32>
    %126 = vector.extract_strided_slice %112 {offsets = [6, 0, 0], sizes = [1, 8, 8], strides = [1, 1, 1]} : vector<8x8x8xf32> to vector<1x8x8xf32>
    %127 = vector.shape_cast %126 : vector<1x8x8xf32> to vector<8x8xf32>
    %128 = vector.extract_strided_slice %112 {offsets = [7, 0, 0], sizes = [1, 8, 8], strides = [1, 1, 1]} : vector<8x8x8xf32> to vector<1x8x8xf32>
    %129 = vector.shape_cast %128 : vector<1x8x8xf32> to vector<8x8xf32>
    %130 = tpu.concatenate %123, %125, %127, %129 in 1 : vector<8x8xf32>, vector<8x8xf32>, vector<8x8xf32>, vector<8x8xf32> -> vector<8x32xf32>
    %131 = tpu.concatenate %121, %130 in 0 : vector<8x32xf32>, vector<8x32xf32> -> vector<16x32xf32>
    %132 = arith.truncf %131 : vector<16x32xf32> to vector<16x32xbf16>
    %c0_24 = arith.constant 0 : index
    %c0_25 = arith.constant 0 : index
    %133 = vector.load %arg6[%c0_24, %c0_25] : memref<32x32xbf16, #tpu.memory_space<vmem>>, vector<32x32xbf16>
    %cst_26 = arith.constant dense<0.000000e+00> : vector<16x32xf32>
    %134 = tpu.matmul %132, %133, %cst_26 {dimension_numbers = #tpu.dot_dimension_numbers<[1], [0], [0], [1], [0, 0, 1, 1], [], []>} : vector<16x32xbf16>, vector<32x32xbf16>, vector<16x32xf32> -> vector<16x32xf32>
    %135 = arith.addf %0, %134 : vector<16x32xf32>
    %136 = vector.broadcast %5 : vector<1x32xf32> to vector<16x32xf32>
    %137 = arith.addf %135, %136 : vector<16x32xf32>
    %cst_27 = arith.constant dense<0.000000e+00> : vector<16xf32>
    %138 = vector.multi_reduction <add>, %137, %cst_27 [1] : vector<16x32xf32> to vector<16xf32>
    %139 = vector.shape_cast %138 : vector<16xf32> to vector<16x1xf32>
    %cst_28 = arith.constant 3.200000e+01 : f32
    %140 = vector.broadcast %cst_28 : f32 to vector<16x1xf32>
    %141 = arith.divf %139, %140 : vector<16x1xf32>
    %142 = vector.broadcast %141 : vector<16x1xf32> to vector<16x32xf32>
    %143 = arith.subf %137, %142 : vector<16x32xf32>
    %144 = vector.broadcast %141 : vector<16x1xf32> to vector<16x32xf32>
    %145 = arith.subf %137, %144 : vector<16x32xf32>
    %146 = arith.mulf %143, %145 : vector<16x32xf32>
    %cst_29 = arith.constant dense<0.000000e+00> : vector<16xf32>
    %147 = vector.multi_reduction <add>, %146, %cst_29 [1] : vector<16x32xf32> to vector<16xf32>
    %148 = vector.shape_cast %147 : vector<16xf32> to vector<16x1xf32>
    %cst_30 = arith.constant 3.200000e+01 : f32
    %149 = vector.broadcast %cst_30 : f32 to vector<16x1xf32>
    %150 = arith.divf %148, %149 : vector<16x1xf32>
    %151 = vector.broadcast %141 : vector<16x1xf32> to vector<16x32xf32>
    %152 = arith.subf %137, %151 : vector<16x32xf32>
    %cst_31 = arith.constant 9.99999974E-6 : f32
    %153 = vector.broadcast %cst_31 : f32 to vector<16x1xf32>
    %154 = arith.addf %150, %153 : vector<16x1xf32>
    %155 = math.rsqrt %154 : vector<16x1xf32>
    %156 = vector.broadcast %155 : vector<16x1xf32> to vector<16x32xf32>
    %157 = arith.mulf %152, %156 : vector<16x32xf32>
    %158 = vector.broadcast %3 : vector<1x32xf32> to vector<16x32xf32>
    %159 = arith.mulf %157, %158 : vector<16x32xf32>
    %160 = vector.broadcast %4 : vector<1x32xf32> to vector<16x32xf32>
    %161 = arith.addf %159, %160 : vector<16x32xf32>
    %162 = arith.truncf %161 : vector<16x32xf32> to vector<16x32xbf16>
    %c0_32 = arith.constant 0 : index
    %c0_33 = arith.constant 0 : index
    %163 = vector.load %arg7[%c0_32, %c0_33] : memref<32x128xbf16, #tpu.memory_space<vmem>>, vector<32x128xbf16>
    %cst_34 = arith.constant dense<0.000000e+00> : vector<16x128xf32>
    %164 = tpu.matmul %162, %163, %cst_34 {dimension_numbers = #tpu.dot_dimension_numbers<[1], [0], [0], [1], [0, 0, 1, 1], [], []>} : vector<16x32xbf16>, vector<32x128xbf16>, vector<16x128xf32> -> vector<16x128xf32>
    %c0_35 = arith.constant 0 : index
    %c0_36 = arith.constant 0 : index
    %165 = vector.load %arg4[%c0_35, %c0_36] : memref<1x128xf32, #tpu.memory_space<vmem>>, vector<1x128xf32>
    %166 = vector.broadcast %165 : vector<1x128xf32> to vector<16x128xf32>
    %167 = arith.addf %164, %166 : vector<16x128xf32>
    %cst_37 = arith.constant 5.000000e-01 : f32
    %168 = vector.broadcast %cst_37 : f32 to vector<16x128xf32>
    %169 = arith.mulf %168, %167 : vector<16x128xf32>
    %cst_38 = arith.constant 0.707106769 : f32
    %170 = vector.broadcast %cst_38 : f32 to vector<16x128xf32>
    %171 = arith.mulf %167, %170 : vector<16x128xf32>
    %172 = math.erf %171 : vector<16x128xf32>
    %cst_39 = arith.constant 1.000000e+00 : f32
    %173 = vector.broadcast %cst_39 : f32 to vector<16x128xf32>
    %174 = arith.addf %173, %172 : vector<16x128xf32>
    %175 = arith.mulf %169, %174 : vector<16x128xf32>
    %176 = arith.truncf %175 : vector<16x128xf32> to vector<16x128xbf16>
    %c0_40 = arith.constant 0 : index
    %c0_41 = arith.constant 0 : index
    %177 = vector.load %arg8[%c0_40, %c0_41] : memref<128x32xbf16, #tpu.memory_space<vmem>>, vector<128x32xbf16>
    %cst_42 = arith.constant dense<0.000000e+00> : vector<16x32xf32>
    %178 = tpu.matmul %176, %177, %cst_42 {dimension_numbers = #tpu.dot_dimension_numbers<[1], [0], [0], [1], [0, 0, 1, 1], [], []>} : vector<16x128xbf16>, vector<128x32xbf16>, vector<16x32xf32> -> vector<16x32xf32>
    %179 = vector.broadcast %6 : vector<1x32xf32> to vector<16x32xf32>
    %180 = arith.addf %178, %179 : vector<16x32xf32>
    %181 = arith.addf %137, %180 : vector<16x32xf32>
    %c0_43 = arith.constant 0 : index
    %c0_44 = arith.constant 0 : index
    %182 = vector.load %arg9[%c0_43, %c0_44] : memref<16x32xf32, #tpu.memory_space<vmem>>, vector<16x32xf32>
    tpu.vector_store %arg9[%c0_43, %c0_44], %181 {strides = array<i32>} : memref<16x32xf32, #tpu.memory_space<vmem>>, vector<16x32xf32>,
    return
  }
  func.func @transform_0(%arg0: i32) -> (i32, i32) {
    %c0_i32 = arith.constant 0 : i32
    %c0_i32_0 = arith.constant 0 : i32
    %c0_i32_1 = arith.constant 0 : i32
    return %c0_i32, %c0_i32_0 : i32, i32
  }
  func.func @transform_1(%arg0: i32) -> (i32, i32) {
    %c0_i32 = arith.constant 0 : i32
    %c0_i32_0 = arith.constant 0 : i32
    %c0_i32_1 = arith.constant 0 : i32
    return %c0_i32, %c0_i32_0 : i32, i32
  }
  func.func @transform_2(%arg0: i32) -> (i32, i32) {
    %c0_i32 = arith.constant 0 : i32
    %c0_i32_0 = arith.constant 0 : i32
    %c0_i32_1 = arith.constant 0 : i32
    return %c0_i32, %c0_i32_0 : i32, i32
  }
  func.func @transform_3(%arg0: i32) -> (i32, i32) {
    %c0_i32 = arith.constant 0 : i32
    %c0_i32_0 = arith.constant 0 : i32
    %c0_i32_1 = arith.constant 0 : i32
    return %c0_i32, %c0_i32_0 : i32, i32
  }
  func.func @transform_4(%arg0: i32) -> (i32, i32) {
    %c0_i32 = arith.constant 0 : i32
    %c0_i32_0 = arith.constant 0 : i32
    %c0_i32_1 = arith.constant 0 : i32
    return %c0_i32, %c0_i32_0 : i32, i32
  }
  func.func @transform_5(%arg0: i32) -> (i32, i32) {
    %c0_i32 = arith.constant 0 : i32
    %c0_i32_0 = arith.constant 0 : i32
    %c0_i32_1 = arith.constant 0 : i32
    return %c0_i32, %c0_i32_0 : i32, i32
  }
  func.func @transform_6(%arg0: i32) -> (i32, i32) {
    %c0_i32 = arith.constant 0 : i32
    %c0_i32_0 = arith.constant 0 : i32
    %c0_i32_1 = arith.constant 0 : i32
    return %c0_i32, %c0_i32_0 : i32, i32
  }
  func.func @transform_7(%arg0: i32) -> (i32, i32) {
    %c0_i32 = arith.constant 0 : i32
    %c0_i32_0 = arith.constant 0 : i32
    %c0_i32_1 = arith.constant 0 : i32
    return %c0_i32, %c0_i32_0 : i32, i32
  }
  func.func @transform_8(%arg0: i32) -> (i32, i32) {
    %c0_i32 = arith.constant 0 : i32
    %c0_i32_0 = arith.constant 0 : i32
    %c0_i32_1 = arith.constant 0 : i32
    return %c0_i32, %c0_i32_0 : i32, i32
  }
}

</mosaic_0001>

<bundles_post_ra>
// kernel: tpu_custom_call.1
= control target key start
LH: loop header
LB: loop body
LE: loop exit
PB: predicated region body
PF: predicated region fallthrough
CT: control target
= control target key end

     0   :  { %vm39_vm0 = vcmask 261120   ;;  %s1501_s0 = inlined_call_operand.vmem [shape: f32[16,32], index: 0, kind: input, shape index: {}]   ;;  %s1502_s1 = inlined_call_operand.vmem [shape: f32[6,32], index: 1, kind: input, shape index: {}]   ;;  %s1503_s2 = inlined_call_operand.vmem [shape: f32[1,96], index: 2, kind: input, shape index: {}]   ;;  %s1504_s3 = inlined_call_operand.vmem [shape: f32[1,128], index: 3, kind: input, shape index: {}]   ;;  %s1505_s4 = inlined_call_operand.vmem [shape: bf16[32,96], index: 4, kind: input, shape index: {}]   ;;  %s1506_s5 = inlined_call_operand.vmem [shape: bf16[32,32], index: 5, kind: input, shape index: {}]   ;;  %s1507_s6 = inlined_call_operand.vmem [shape: bf16[32,128], index: 6, kind: input, shape index: {}]   ;;  %s1508_s7 = inlined_call_operand.vmem [shape: bf16[128,32], index: 7, kind: input, shape index: {}]   ;;  %s1509_s8 = inlined_call_operand.hbm [shape: f32[16,32], index: 8, kind: output, shape index: {}]  }
   0x1   :  { %v1230_v0 = vld [vmem:[%s1501_s0] sm:$0xff] }
   0x2   :  { %v40_v1 = vsel %vm39_vm0, %v1230_v0, 0.0 }
   0x3   :  { %41 = vadd.xlane.f32.xlu0 %v40_v1 }
   0x4   :  { %13 = vsyncpa [#allocation3], 0  ;;  %v1237_v2 = vld [vmem:[%s1501_s0 + $0x8] sm:$0xff]  ;;  %v1170_v4 = vmov 32.0   ;;  %v1049_v23 = vld [vmem:[%s1505_s4] sm:$0xff]  ;;  %s1171_s17 = smov 104  }
   0x5   :  { %v43_v3 = vsel %vm39_vm0, %v1237_v2, 0.0  ;;  %1098 = vrcp.f32 %v1170_v4  ;;  %v1050_v21 = vld [vmem:[%s1505_s4 + $0x8] sm:$0xff]  ;;  %v1090_v42 = vld [vmem:[%s1502_s1] ss:$0 sm:$0xff]  ;;  %v1091_v47 = vld [vmem:[%s1502_s1 + $0x1] ss:$0 sm:$0xff] }
   0x6   :  { %127 = vmatpush.bf16.msra.mxu0 %v1050_v21  ;;  %v1092_v52 = vld [vmem:[%s1503_s2] ss:$0 sm:$0xff]  ;;  %s1172_s18 = smov 120   ;;  %s1173_s19 = smov 112   ;;  %vm161_vm8 = vcmask 64512   ;;  %vm459_vm10 = vcmask 1043456  }
   0x7   :  { %s1174_s2 = smov 96   ;;  %s1176_s20 = smov 64   ;;  %vm636_vm11 = vcmask 130048   ;;  %vm638_vm12 = vcmask 195584  }
   0x8   :  { %s1177_s21 = smov 24   ;;  %s1178_s22 = smov 8  }
   0x9   :  { %s1179_s23 = smov 16   ;;  %s1180_s29 = smov [#allocation2]  }
   0xa   :  { %128 = vmatpush.bf16.msra.mxu0 %v1049_v23  ;;  %s958_s30 = sshll.u32 %s1180_s29, 4  ;;  %s959_s30 = int_to_ptr.vmem [resolvable:$true] %s958_s30 }
   0xb   :  { %44 = vadd.xlane.f32.xlu0 %v43_v3  ;;  %v1099_v5 = vpop.eup %1098 }
   0xc   :  { %v47_v6 = vmul.f32 32.0, %v1099_v5  ;;  %vm51_vm1 = vweird.f32 %v1099_v5 }
   0xe   :  { %v48_v7 = vsub.f32 1.0, %v47_v6 }
  0x10   :  { %v49_v8 = vmul.f32 %v1099_v5, %v48_v7 }
  0x12   :  { %v50_v9 = vadd.f32 %v1099_v5, %v49_v8 }
  0x14   :  { %v1241_v10 = vsel %vm51_vm1, %v1099_v5, %v50_v9 }
  0x76   :  { %v42_v11 = vpop.xlane.xlu0 %41 }
  0x77   :  { %v53_v12 = vmul.f32 %v1241_v10, %v42_v11 }
  0x79   :  { %v55_v13 = vsub.f32 %v1230_v0, %v53_v12 }
  0x7b   :  { %v57_v14 = vmul.f32 %v55_v13, %v55_v13 }
  0x7d   :  { %v59_v15 = vsel %vm39_vm0, %v57_v14, 0.0 }
  0x7e   :  { %60 = vadd.xlane.f32.xlu1 %v59_v15  ;;  %v45_v16 = vpop.xlane.xlu0 %44 }
  0x7f   :  { %v54_v17 = vmul.f32 %v1241_v10, %v45_v16 }
  0x81   :  { %v56_v18 = vsub.f32 %v1237_v2, %v54_v17 }
  0x83   :  { %v58_v19 = vmul.f32 %v56_v18, %v56_v18 }
  0x85   :  { %v62_v20 = vsel %vm39_vm0, %v58_v19, 0.0 }
  0x86   :  { %63 = vadd.xlane.f32.xlu1 %v62_v20 }
  0xf1   :  { %v61_v22 = vpop.xlane.xlu1 %60 }
  0xf2   :  { %v65_v24 = vmul.f32 %v61_v22, %v1241_v10 }
  0xf4   :  { %v67_v25 = vadd.f32 1e-05, %v65_v24 }
  0xf6   :  { %1100 = vrsqrt.f32 %v67_v25  ;;  %vm75_vm3 = vweird.f32 %v67_v25 }
  0xf9   :  { %v64_v26 = vpop.xlane.xlu1 %63 }
  0xfa   :  { %v66_v27 = vmul.f32 %v64_v26, %v1241_v10 }
  0xfc   :  { %v1101_v28 = vpop.eup %1100  ;;  %v68_v29 = vadd.f32 1e-05, %v66_v27 }
  0xfd   :  { %v70_v30 = vmul.f32 %v1101_v28, %v67_v25  ;;  %vm76_vm2 = vweird.f32 %v1101_v28 }
  0xfe   :  { %1102 = vrsqrt.f32 %v68_v29  ;;  %vm77_vm4 = vmor %vm75_vm3, %vm76_vm2  ;;  %vm85_vm6 = vweird.f32 %v68_v29 }
  0xff   :  { %v71_v31 = vmul.f32 %v1101_v28, %v70_v30 }
 0x101   :  { %v72_v32 = vmul.f32 0.5, %v71_v31 }
 0x103   :  { %v73_v33 = vsub.f32 1.5, %v72_v32 }
 0x104   :  { %v1103_v34 = vpop.eup %1102 }
 0x105   :  { %v74_v35 = vmul.f32 %v1101_v28, %v73_v33  ;;  %v80_v36 = vmul.f32 %v1103_v34, %v68_v29  ;;  %vm86_vm5 = vweird.f32 %v1103_v34 }
 0x106   :  { %vm87_vm7 = vmor %vm85_vm6, %vm86_vm5 }
 0x107   :  { %v81_v37 = vmul.f32 %v1103_v34, %v80_v36  ;;  %v78_v38 = vsel %vm77_vm4, %v1101_v28, %v74_v35 }
 0x108   :  { %v89_v41 = vmul.f32 %v78_v38, %v55_v13  ;;  %v151_v38 = vlaneseq }
 0x109   :  { %v82_v39 = vmul.f32 0.5, %v81_v37 }
 0x10a   :  { %v92_v46 = vmul.f32 %v1090_v42, %v89_v41 }
 0x10b   :  { %v83_v40 = vsub.f32 1.5, %v82_v39  ;;  %v152_v39 = vshrl.u32 %v151_v38, 7 }
 0x10c   :  { %v95_v49 = vadd.f32 %v1091_v47, %v92_v46 }
 0x10d   :  { %v84_v43 = vmul.f32 %v1103_v34, %v83_v40  ;;  %v154_v40 = vand.u32 127, %v151_v38 }
 0x10f   :  { %v88_v44 = vsel %vm87_vm7, %v1103_v34, %v84_v43  ;;  %vm155_vm9 = vcmp.ge.s32.totalorder %v152_v39, %v154_v40  ;;  %v1175_v43 = vmov -1e+30  }
 0x110   :  { %v90_v45 = vmul.f32 %v88_v44, %v56_v18  ;;  %v156_v44 = vsel %vm155_vm9, 0.0, %v1175_v43 }
 0x112   :  { %v93_v48 = vmul.f32 %v1090_v42, %v90_v45 }
 0x114   :  { %v96_v50 = vadd.f32 %v1091_v47, %v93_v48 }
 0x116   :  { %v97_v51 = vpack.c.bf16 %v96_v50, %v95_v49 }
 0x118   :  { %980 = vmatmul.msk.bf16.vlgmr.msra.gmra.mxu0 %vm39_vm0, %v97_v51 }
 0x195   :  { %v130_v53 = vpop.f32.mrf.mxu0 }
 0x196   :  { %v131_v54 = vadd.f32 %v1092_v52, %v130_v53 }
 0x198   :  { %v1267_v55 = vpack.c.bf16 %v131_v54, %v131_v54 }
 0x19a   :  { %142 = vrot.lane.b32.xlu0 %v1267_v55, %s1171_s17  ;;  %138 = vrot.lane.b32.xlu2 %v1267_v55, %s1172_s18  ;;  %v157_v18 = vunpack.c.l.b16 %v1267_v55 }
 0x19c   :  { %v1300_v19 = vpack.c.b16 %v157_v18, %v157_v18 }
 0x19d   :  { %v132_v56 = vpop.f32.mrf.mxu0 }
 0x19e   :  { %v133_v57 = vadd.f32 %v1092_v52, %v132_v56 }
 0x1a0   :  { %v1271_v58 = vpack.c.bf16 %v133_v57, %v133_v57 }
 0x1a2   :  { %145 = vrot.lane.b32.xlu1 %v1271_v58, %s1172_s18  ;;  %140 = vrot.lane.b32.xlu2 %v1267_v55, %s1173_s19  ;;  %v250_v6 = vunpack.c.l.b16 %v1271_v58 }
 0x1a4   :  { %v1289_v11 = vpack.c.b16 %v250_v6, %v250_v6 }
 0x1aa   :  { %147 = vrot.lane.b32.xlu2 %v1271_v58, %s1173_s19 }
 0x1b2   :  { %149 = vrot.lane.b32.xlu2 %v1271_v58, %s1171_s17 }
 0x1f4   :  { %v139_v59 = vpop.permute.xlu2 %138 }
 0x1f5   :  { %v181_v60 = vunpack.c.l.b16 %v139_v59 }
 0x1f7   :  { %v1277_v61 = vpack.c.b16 %v181_v60, %v181_v60 }
 0x1f9   :  { %183 = vrot.lane.b32.xlu2 %v1277_v61, %s1174_s2 }
 0x1fc   :  { %v141_v62 = vpop.permute.xlu2 %140 }
 0x1fd   :  { %v204_v63 = vunpack.c.l.b16 %v141_v62 }
 0x1ff   :  { %v1280_v1 = vpack.c.b16 %v204_v63, %v204_v63 }
 0x201   :  { %206 = vrot.lane.b32.xlu0 %v1280_v1, %s1174_s2 }
 0x204   :  { %v148_v3 = vpop.permute.xlu2 %147 }
 0x205   :  { %v296_v4 = vunpack.c.l.b16 %v148_v3 }
 0x207   :  { %v1283_v5 = vpack.c.b16 %v296_v4, %v296_v4 }
 0x209   :  { %298 = vrot.lane.b32.xlu0 %v1283_v5, %s1174_s2 }
 0x20c   :  { %v143_v7 = vpop.permute.xlu0 %142  ;;  %v150_v12 = vpop.permute.xlu2 %149 }
 0x20d   :  { %v227_v8 = vunpack.c.l.b16 %v143_v7  ;;  %v319_v13 = vunpack.c.l.b16 %v150_v12 }
 0x20f   :  { %v1287_v9 = vpack.c.b16 %v227_v8, %v227_v8  ;;  %v1293_v16 = vpack.c.b16 %v319_v13, %v319_v13 }
 0x211   :  { %229 = vrot.lane.b32.xlu2 %v1287_v9, %s1174_s2  ;;  %252 = vrot.lane.b32.xlu0 %v1289_v11, %s1174_s2 }
 0x214   :  { %v146_v14 = vpop.permute.xlu1 %145 }
 0x215   :  { %v273_v15 = vunpack.c.l.b16 %v146_v14 }
 0x217   :  { %v1295_v17 = vpack.c.b16 %v273_v15, %v273_v15 }
 0x219   :  { %275 = vrot.lane.b32.xlu1 %v1295_v17, %s1174_s2  ;;  %321 = vrot.lane.b32.xlu2 %v1293_v16, %s1174_s2 }
 0x221   :  { %159 = vrot.lane.b32.xlu1 %v1300_v19, %s1174_s2 }
 0x253   :  { %v184_v20 = vpop.permute.xlu2 %183 }
 0x254   :  { %v189_v21 = vsel %vm161_vm8, %v184_v20, 0 }
 0x255   :  { %198 = vmatpush.bf16.xpose.msra.mxu2 %v189_v21 }
 0x25c   :  { %982 = vmatmul.msk.bf16.vlgmr.msra.gmra.mxu2 %vm161_vm8, %v139_v59 }
 0x26b   :  { %v230_v22 = vpop.permute.xlu2 %229 }
 0x26c   :  { %v235_v23 = vsel %vm161_vm8, %v230_v22, 0 }
 0x26d   :  { %244 = vmatpush.bf16.xpose.msrb.mxu0 %v235_v23 }
 0x273   :  { %v207_v24 = vpop.permute.xlu0 %206  ;;  %v322_v25 = vpop.permute.xlu2 %321 }
 0x274   :  { %v327_v26 = vsel %vm161_vm8, %v322_v25, 0  ;;  %984 = vmatmul.msk.bf16.vlgmr.msrb.gmra.mxu0 %vm161_vm8, %v143_v7  ;;  %v212_v27 = vsel %vm161_vm8, %v207_v24, 0 }
 0x275   :  { %221 = vmatpush.bf16.xpose.msra.mxu3 %v212_v27  ;;  %336 = vmatpush.bf16.xpose.msra.mxu0 %v327_v26 }
 0x27b   :  { %v299_v28 = vpop.permute.xlu0 %298 }
 0x27c   :  { %983 = vmatmul.msk.bf16.vlgmr.msra.gmra.mxu3 %vm161_vm8, %v141_v62  ;;  %v304_v29 = vsel %vm161_vm8, %v299_v28, 0 }
 0x27d   :  { %313 = vmatpush.bf16.xpose.msrb.mxu3 %v304_v29 }
 0x283   :  { %v253_v32 = vpop.permute.xlu0 %252 }
 0x284   :  { %988 = vmatmul.msk.bf16.vlgmr.msra.gmra.mxu0 %vm161_vm8, %v150_v12  ;;  %v258_v35 = vsel %vm161_vm8, %v253_v32, 0 }
 0x28b   :  { %v276_v30 = vpop.permute.xlu1 %275 }
 0x28c   :  { %987 = vmatmul.msk.bf16.vlgmr.msrb.gmra.mxu3 %vm161_vm8, %v148_v3  ;;  %v281_v31 = vsel %vm161_vm8, %v276_v30, 0 }
 0x28d   :  { %290 = vmatpush.bf16.xpose.msrb.mxu2 %v281_v31 }
 0x293   :  { %v160_v33 = vpop.permute.xlu1 %159 }
 0x294   :  { %986 = vmatmul.msk.bf16.vlgmr.msrb.gmra.mxu2 %vm161_vm8, %v146_v14  ;;  %v166_v34 = vsel %vm161_vm8, %v160_v33, 0 }
 0x295   :  { %175 = vmatpush.bf16.xpose.msra.mxu1 %v166_v34 }
 0x29c   :  { %981 = vmatmul.msk.bf16.vlgmr.msra.gmra.mxu1 %vm161_vm8, %v1267_v55 }
 0x29d   :  { %267 = vmatpush.bf16.xpose.msrb.mxu1 %v258_v35 }
 0x2ac   :  { %985 = vmatmul.msk.bf16.vlgmr.msrb.gmra.mxu1 %vm161_vm8, %v1271_v58 }
 0x2df   :  { %v200_v36 = vpop.f32.mrf.mxu2 }
 0x2e0   :  { %v343_v8 = vmul.f32 0.35355338, %v200_v36 }
 0x2e2   :  { %v351_v15 = vadd.f32 %v343_v8, %v156_v44 }
 0x2e4   :  { %v361_v20 = vsel %vm161_vm8, %v351_v15, -inf }
 0x2e7   :  { %v202_v37 = vpop.f32.mrf.mxu2 }
 0x2f1   :  { %v246_v41 = vpop.f32.mrf.mxu0 }
 0x2f2   :  { %v345_v42 = vmul.f32 0.35355338, %v246_v41 }
 0x2f4   :  { %v353_v45 = vadd.f32 %v345_v42, %v156_v44 }
 0x2f6   :  { %v367_v46 = vsel %vm161_vm8, %v353_v45, -inf }
 0x2f7   :  { %368 = vmax.xlane.f32.xlu0 %v367_v46 }
 0x2f9   :  { %v248_v47 = vpop.f32.mrf.mxu0 }
 0x2ff   :  { %v223_v48 = vpop.f32.mrf.mxu3 }
 0x300   :  { %v344_v49 = vmul.f32 0.35355338, %v223_v48 }
 0x301   :  { %v338_v50 = vpop.f32.mrf.mxu0 }
 0x302   :  { %v349_v51 = vmul.f32 0.35355338, %v338_v50  ;;  %v352_v52 = vadd.f32 %v344_v49, %v156_v44 }
 0x304   :  { %v364_v53 = vsel %vm161_vm8, %v352_v52, -inf  ;;  %v1323_v54 = vadd.f32 %v349_v51, %v156_v44 }
 0x305   :  { %365 = vmax.xlane.f32.xlu1 %v364_v53 }
 0x306   :  { %v379_v55 = vsel %vm161_vm8, %v1323_v54, -inf }
 0x307   :  { %v225_v56 = vpop.f32.mrf.mxu3  ;;  %380 = vmax.xlane.f32.xlu0 %v379_v55 }
 0x309   :  { %v340_v57 = vpop.f32.mrf.mxu0 }
 0x30f   :  { %v315_v58 = vpop.f32.mrf.mxu3 }
 0x310   :  { %v348_v59 = vmul.f32 0.35355338, %v315_v58 }
 0x312   :  { %v1327_v60 = vadd.f32 %v348_v59, %v156_v44 }
 0x314   :  { %v376_v62 = vsel %vm161_vm8, %v1327_v60, -inf }
 0x315   :  { %377 = vmax.xlane.f32.xlu1 %v376_v62 }
 0x317   :  { %v292_v63 = vpop.f32.mrf.mxu2  ;;  %v317_v3 = vpop.f32.mrf.mxu3 }
 0x318   :  { %v347_v18 = vmul.f32 0.35355338, %v292_v63 }
 0x319   :  { %v177_v4 = vpop.f32.mrf.mxu1 }
 0x31a   :  { %v342_v6 = vmul.f32 0.35355338, %v177_v4  ;;  %v355_v23 = vadd.f32 %v347_v18, %v156_v44 }
 0x31c   :  { %v1331_v7 = vadd.f32 %v342_v6, %v156_v44  ;;  %v373_v25 = vsel %vm161_vm8, %v355_v23, -inf }
 0x31e   :  { %v358_v12 = vsel %vm161_vm8, %v1331_v7, -inf }
 0x31f   :  { %v294_v13 = vpop.f32.mrf.mxu2  ;;  %359 = vmax.xlane.f32.xlu2 %v358_v12 }
 0x321   :  { %v179_v14 = vpop.f32.mrf.mxu1 }
 0x327   :  { %362 = vmax.xlane.f32.xlu2 %v361_v20 }
 0x329   :  { %v269_v21 = vpop.f32.mrf.mxu1 }
 0x32a   :  { %v346_v22 = vmul.f32 0.35355338, %v269_v21 }
 0x32c   :  { %v354_v24 = vadd.f32 %v346_v22, %v156_v44 }
 0x32e   :  { %v370_v26 = vsel %vm161_vm8, %v354_v24, -inf }
 0x32f   :  { %374 = vmax.xlane.f32.xlu2 %v373_v25  ;;  %371 = vmax.xlane.f32.xlu0 %v370_v26 }
 0x331   :  { %v271_v27 = vpop.f32.mrf.mxu1 }
 0x343   :  { %518 = vrot.lane.b32.xlu0 %v1287_v9, %s1176_s20 }
 0x34b   :  { %560 = vrot.lane.b32.xlu0 %v1295_v17, %s1176_s20 }
 0x353   :  { %581 = vrot.lane.b32.xlu0 %v1283_v5, %s1176_s20 }
 0x36a   :  { %v369_v28 = vpop.xlane.xlu0 %368 }
 0x36b   :  { %v385_v29 = vsub.f32 %v353_v45, %v369_v28 }
 0x36d   :  { %v396_v30 = vmul.f32 1.442695, %v385_v29 }
 0x36f   :  { %1104 = vpow2.f32 %v396_v30 }
 0x375   :  { %v1344_v31 = vpop.eup %1104 }
 0x376   :  { %v415_v32 = vsel %vm161_vm8, %v1344_v31, 0.0 }
 0x377   :  { %416 = vadd.xlane.f32.xlu2 %v415_v32 }
 0x378   :  { %v366_v33 = vpop.xlane.xlu1 %365 }
 0x379   :  { %v384_v34 = vsub.f32 %v352_v52, %v366_v33 }
 0x37a   :  { %v381_v40 = vpop.xlane.xlu0 %380 }
 0x37b   :  { %v394_v35 = vmul.f32 1.442695, %v384_v34  ;;  %v389_v44 = vsub.f32 %v1323_v54, %v381_v40 }
 0x37d   :  { %1106 = vpow2.f32 %v394_v35  ;;  %v404_v46 = vmul.f32 1.442695, %v389_v44 }
 0x383   :  { %v1348_v9 = vpop.eup %1106 }
 0x384   :  { %v412_v17 = vsel %vm161_vm8, %v1348_v9, 0.0 }
 0x385   :  { %413 = vadd.xlane.f32.xlu0 %v412_v17 }
 0x388   :  { %v378_v57 = vpop.xlane.xlu1 %377 }
 0x389   :  { %v388_v58 = vsub.f32 %v1327_v60, %v378_v57 }
 0x38b   :  { %v402_v62 = vmul.f32 1.442695, %v388_v58 }
 0x38f   :  { %497 = vrot.lane.b32.xlu2 %v1280_v1, %s1176_s20 }
 0x392   :  { %v360_v5 = vpop.xlane.xlu2 %359 }
 0x393   :  { %v382_v59 = vsub.f32 %v1331_v7, %v360_v5 }
 0x395   :  { %v390_v63 = vmul.f32 1.442695, %v382_v59 }
 0x39a   :  { %v363_v36 = vpop.xlane.xlu2 %362 }
 0x39b   :  { %v383_v37 = vsub.f32 %v351_v15, %v363_v36 }
 0x39d   :  { %v392_v38 = vmul.f32 1.442695, %v383_v37 }
 0x39f   :  { %1108 = vpow2.f32 %v392_v38 }
 0x3a2   :  { %v375_v39 = vpop.xlane.xlu2 %374  ;;  %v372_v1 = vpop.xlane.xlu0 %371 }
 0x3a3   :  { %v387_v41 = vsub.f32 %v355_v23, %v375_v39  ;;  %v386_v48 = vsub.f32 %v354_v24, %v372_v1 }
 0x3a5   :  { %v1354_v42 = vpop.eup %1108  ;;  %v400_v43 = vmul.f32 1.442695, %v387_v41  ;;  %v398_v50 = vmul.f32 1.442695, %v386_v48 }
 0x3a6   :  { %v409_v45 = vsel %vm161_vm8, %v1354_v42, 0.0 }
 0x3a7   :  { %1110 = vpow2.f32 %v400_v43  ;;  %410 = vadd.xlane.f32.xlu1 %v409_v45 }
 0x3a8   :  { %1112 = vpow2.f32 %v404_v46 }
 0x3a9   :  { %1114 = vpow2.f32 %v398_v50 }
 0x3aa   :  { %1116 = vpow2.f32 %v402_v62 }
 0x3ab   :  { %1118 = vpow2.f32 %v390_v63 }
 0x3ad   :  { %v1359_v47 = vpop.eup %1110 }
 0x3ae   :  { %v421_v49 = vsel %vm161_vm8, %v1359_v47, 0.0  ;;  %v1113_v51 = vpop.eup %1112 }
 0x3af   :  { %422 = vadd.xlane.f32.xlu0 %v421_v49  ;;  %v427_v54 = vsel %vm161_vm8, %v1113_v51, 0.0  ;;  %v1365_v55 = vpop.eup %1114 }
 0x3b0   :  { %v418_v56 = vsel %vm161_vm8, %v1365_v55, 0.0  ;;  %v1117_v3 = vpop.eup %1116 }
 0x3b1   :  { %v1119_v6 = vpop.eup %1118 }
 0x3b5   :  { %v519_v52 = vpop.permute.xlu0 %518 }
 0x3b6   :  { %v524_v53 = vsel %vm459_vm10, %v519_v52, 0 }
 0x3b7   :  { %533 = vmatpush.bf16.msrb.mxu0 %v524_v53 }
 0x3b8   :  { %428 = vadd.xlane.f32.xlu2 %v427_v54 }
 0x3bd   :  { %v561_v4 = vpop.permute.xlu0 %560 }
 0x3c0   :  { %476 = vrot.lane.b32.xlu1 %v1277_v61, %s1176_s20  ;;  %419 = vadd.xlane.f32.xlu2 %v418_v56  ;;  %v424_v61 = vsel %vm161_vm8, %v1117_v3, 0.0 }
 0x3c3   :  { %602 = vrot.lane.b32.xlu0 %v1293_v16, %s1176_s20  ;;  %v406_v16 = vsel %vm161_vm8, %v1119_v6, 0.0 }
 0x3c5   :  { %v582_v60 = vpop.permute.xlu0 %581 }
 0x3c6   :  { %v587_v14 = vsel %vm459_vm10, %v582_v60, 0 }
 0x3d8   :  { %539 = vrot.lane.b32.xlu2 %v1289_v11, %s1176_s20 }
 0x3ea   :  { %v417_v8 = vpop.xlane.xlu2 %416  ;;  %425 = vadd.xlane.f32.xlu1 %v424_v61 }
 0x3eb   :  { %1120 = vrcp.f32 %v417_v8 }
 0x3ed   :  { %407 = vadd.xlane.f32.xlu0 %v406_v16 }
 0x3f1   :  { %v1121_v12 = vpop.eup %1120 }
 0x3f2   :  { %v441_v11 = vmul.f32 %v1121_v12, %v1344_v31  ;;  %v498_v7 = vpop.permute.xlu2 %497  ;;  %v566_v31 = vsel %vm459_vm10, %v561_v4, 0 }
 0x3f3   :  { %v503_v13 = vsel %vm459_vm10, %v498_v7, 0  ;;  %v1051_v7 = vld [vmem:[%s1506_s5] sm:$0xff] }
 0x3f4   :  { %v449_v15 = vpack.c.bf16 %v441_v11, %v441_v11  ;;  %512 = vmatpush.bf16.msra.mxu3 %v503_v13  ;;  %v1052_v11 = vld [vmem:[%s1506_s5 + $0x8] sm:$0xff] }
 0x3f6   :  { %992 = vmatmul.msk.bf16.vlgmr.msrb.gmra.mxu0 %vm161_vm8, %v449_v15 }
 0x3f8   :  { %596 = vmatpush.bf16.msrb.mxu3 %v587_v14  ;;  %v414_v18 = vpop.xlane.xlu0 %413 }
 0x3f9   :  { %1122 = vrcp.f32 %v414_v18 }
 0x3ff   :  { %v1123_v20 = vpop.eup %1122 }
 0x400   :  { %v440_v21 = vmul.f32 %v1123_v20, %v1348_v9 }
 0x402   :  { %v448_v22 = vpack.c.bf16 %v440_v21, %v440_v21 }
 0x403   :  { %454 = vrot.lane.b32.xlu1 %v1300_v19, %s1176_s20 }
 0x404   :  { %991 = vmatmul.msk.bf16.vlgmr.msra.gmra.mxu3 %vm161_vm8, %v448_v22 }
 0x41a   :  { %v411_v23 = vpop.xlane.xlu1 %410 }
 0x41b   :  { %1124 = vrcp.f32 %v411_v23 }
 0x421   :  { %v1125_v26 = vpop.eup %1124 }
 0x422   :  { %v423_v25 = vpop.xlane.xlu0 %422  ;;  %v439_v27 = vmul.f32 %v1125_v26, %v1354_v42 }
 0x424   :  { %v447_v33 = vpack.c.bf16 %v439_v27, %v439_v27 }
 0x42b   :  { %v429_v24 = vpop.xlane.xlu2 %428 }
 0x42c   :  { %1126 = vrcp.f32 %v429_v24 }
 0x42d   :  { %1128 = vrcp.f32 %v423_v25 }
 0x432   :  { %v1127_v28 = vpop.eup %1126  ;;  %v477_v29 = vpop.permute.xlu1 %476 }
 0x433   :  { %v482_v30 = vsel %vm459_vm10, %v477_v29, 0  ;;  %v445_v32 = vmul.f32 %v1127_v28, %v1113_v51  ;;  %v1129_v9 = vpop.eup %1128  ;;  %v420_v41 = vpop.xlane.xlu2 %419 }
 0x434   :  { %491 = vmatpush.bf16.msra.mxu2 %v482_v30  ;;  %v443_v17 = vmul.f32 %v1129_v9, %v1359_v47 }
 0x435   :  { %v603_v19 = vpop.permute.xlu0 %602  ;;  %v453_v35 = vpack.c.bf16 %v445_v32, %v445_v32  ;;  %v1093_v32 = vld [vmem:[%s1502_s1 + $0x4] ss:$0 sm:$0xff] }
 0x436   :  { %v608_v34 = vsel %vm459_vm10, %v603_v19, 0  ;;  %v451_v5 = vpack.c.bf16 %v443_v17, %v443_v17 }
 0x437   :  { %990 = vmatmul.msk.bf16.vlgmr.msra.gmra.mxu2 %vm161_vm8, %v447_v33  ;;  %617 = vmatpush.bf16.msra.mxu0 %v608_v34 }
 0x438   :  { %575 = vmatpush.bf16.msrb.mxu2 %v566_v31 }
 0x43a   :  { %996 = vmatmul.msk.bf16.vlgmr.msra.gmra.mxu0 %vm161_vm8, %v453_v35 }
 0x43b   :  { %v540_v44 = vpop.permute.xlu2 %539 }
 0x43c   :  { %v545_v47 = vsel %vm459_vm10, %v540_v44, 0 }
 0x447   :  { %994 = vmatmul.msk.bf16.vlgmr.msrb.gmra.mxu2 %vm161_vm8, %v451_v5 }
 0x45d   :  { %v426_v36 = vpop.xlane.xlu1 %425 }
 0x45e   :  { %1130 = vrcp.f32 %v426_v36 }
 0x460   :  { %v408_v40 = vpop.xlane.xlu0 %407 }
 0x461   :  { %1132 = vrcp.f32 %v408_v40 }
 0x462   :  { %1134 = vrcp.f32 %v420_v41 }
 0x464   :  { %v1131_v37 = vpop.eup %1130 }
 0x465   :  { %v444_v38 = vmul.f32 %v1131_v37, %v1117_v3 }
 0x467   :  { %v452_v39 = vpack.c.bf16 %v444_v38, %v444_v38  ;;  %v1133_v42 = vpop.eup %1132 }
 0x468   :  { %v438_v45 = vmul.f32 %v1133_v42, %v1119_v6  ;;  %v1135_v50 = vpop.eup %1134 }
 0x469   :  { %995 = vmatmul.msk.bf16.vlgmr.msrb.gmra.mxu3 %vm161_vm8, %v452_v39  ;;  %v442_v51 = vmul.f32 %v1135_v50, %v1365_v55 }
 0x46a   :  { %v446_v48 = vpack.c.bf16 %v438_v45, %v438_v45  ;;  %v1054_v45 = vld [vmem:[%s1507_s6 + $0x8] sm:$0xff] }
 0x46b   :  { %v450_v53 = vpack.c.bf16 %v442_v51, %v442_v51  ;;  %774 = vmatpush.bf16.msra.mxu2 %v1054_v45  ;;  %v1057_v45 = vld [vmem:[%s1508_s7 + $0x10] sm:$0xff] }
 0x473   :  { %v535_v43 = vpop.f32.mrf.mxu0 }
 0x475   :  { %v455_v46 = vpop.permute.xlu1 %454 }
 0x476   :  { %v461_v1 = vsel %vm459_vm10, %v455_v46, 0 }
 0x477   :  { %470 = vmatpush.bf16.msra.mxu1 %v461_v1 }
 0x47a   :  { %989 = vmatmul.msk.bf16.vlgmr.msra.gmra.mxu1 %vm161_vm8, %v446_v48  ;;  %v1053_v48 = vld [vmem:[%s1507_s6] sm:$0xff]  ;;  %s960_s6 = sshll.u32 %s1509_s8, 4  ;;  %s961_s6 = int_to_ptr.hbm [resolvable:$true] %s960_s6 }
 0x47b   :  { %554 = vmatpush.bf16.msrb.mxu1 %v545_v47  ;;  %v537_v49 = vpop.f32.mrf.mxu0  ;;  %775 = vmatpush.bf16.msra.mxu2 %v1053_v48 }
 0x47f   :  { %681 = vmatpush.bf16.msra.mxu1 %v1052_v11 }
 0x483   :  { %682 = vmatpush.bf16.msra.mxu1 %v1051_v7 }
 0x487   :  { %v514_v52 = vpop.f32.mrf.mxu3 }
 0x48a   :  { %993 = vmatmul.msk.bf16.vlgmr.msrb.gmra.mxu1 %vm161_vm8, %v450_v53 }
 0x48f   :  { %v516_v54 = vpop.f32.mrf.mxu3 }
 0x4b7   :  { %v619_v56 = vpop.f32.mrf.mxu0 }
 0x4b8   :  { %v1085_v57 = vpack.i.bf16 %v619_v56, %v535_v43 }
 0x4ba   :  { %1086 = vrot.lane.b32.xlu2 %v1085_v57, %s1177_s21  ;;  %v493_v58 = vpop.f32.mrf.mxu2 }
 0x4bf   :  { %v621_v59 = vpop.f32.mrf.mxu0 }
 0x4c2   :  { %v495_v62 = vpop.f32.mrf.mxu2 }
 0x4ca   :  { %v577_v63 = vpop.f32.mrf.mxu2 }
 0x4cb   :  { %v1075_v3 = vpack.i.bf16 %v577_v63, %v493_v58 }
 0x4cd   :  { %1076 = vrot.lane.b32.xlu1 %v1075_v3, %s1178_s22 }
 0x4d2   :  { %v579_v4 = vpop.f32.mrf.mxu2 }
 0x4ec   :  { %v598_v6 = vpop.f32.mrf.mxu3 }
 0x4ed   :  { %v1080_v55 = vpack.i.bf16 %v598_v6, %v514_v52 }
 0x4ef   :  { %1081 = vrot.lane.b32.xlu1 %v1080_v55, %s1179_s23 }
 0x4f4   :  { %v600_v61 = vpop.f32.mrf.mxu3 }
 0x4f7   :  { %v472_v8 = vpop.f32.mrf.mxu1 }
 0x4ff   :  { %v474_v16 = vpop.f32.mrf.mxu1 }
 0x500   :  { %v1095_v16 = vld [vmem:[%s1502_s1 + $0x3] ss:$0 sm:$0xff] }
 0x507   :  { %v556_v60 = vpop.f32.mrf.mxu1 }
 0x50f   :  { %v558_v12 = vpop.f32.mrf.mxu1 }
 0x514   :  { %v1087_v18 = vpop.permute.xlu2 %1086 }
 0x515   :  { %v1089_v23 = vunpack.i.h.bf16 %v1087_v18  ;;  %v1088_v24 = vunpack.i.l.bf16 %v1087_v18 }
 0x53f   :  { %v1077_v13 = vpop.permute.xlu1 %1076 }
 0x540   :  { %v1079_v14 = vunpack.i.h.bf16 %v1077_v13  ;;  %v1078_v15 = vunpack.i.l.bf16 %v1077_v13 }
 0x542   :  { %v652_v25 = vsel %vm161_vm8, %v556_v60, %v1079_v14  ;;  %v635_v26 = vsel %vm161_vm8, %v472_v8, %v1078_v15  ;;  %v1096_v15 = vld [vmem:[%s1504_s3] ss:$0 sm:$0xff] }
 0x561   :  { %v1082_v20 = vpop.permute.xlu1 %1081 }
 0x562   :  { %v1084_v21 = vunpack.i.h.bf16 %v1082_v20  ;;  %v1083_v22 = vunpack.i.l.bf16 %v1082_v20 }
 0x564   :  { %v637_v27 = vsel %vm636_vm11, %v635_v26, %v1083_v22  ;;  %v653_v28 = vsel %vm636_vm11, %v652_v25, %v1084_v21  ;;  %v1062_v21 = vld [vmem:[%s1508_s7 + $0x38] sm:$0xff] }
 0x565   :  { %v639_v29 = vsel %vm638_vm12, %v637_v27, %v1088_v24  ;;  %v654_v30 = vsel %vm638_vm12, %v653_v28, %v1089_v23  ;;  %936 = vmatpush.bf16.msra.mxu3 %v1062_v21  ;;  %v1061_v24 = vld [vmem:[%s1508_s7 + $0x30] sm:$0xff] }
 0x566   :  { %v655_v31 = vpack.c.bf16 %v654_v30, %v639_v29  ;;  %v1060_v30 = vld [vmem:[%s1508_s7 + $0x28] sm:$0xff] }
 0x568   :  { %1005 = vmatmul.msk.bf16.vlgmr.msra.gmra.mxu1 %vm39_vm0, %v655_v31 }
 0x569   :  { %937 = vmatpush.bf16.msra.mxu3 %v1061_v24 }
 0x56d   :  { %938 = vmatpush.bf16.msra.mxu3 %v1060_v30 }
 0x5e5   :  { %v684_v33 = vpop.f32.mrf.mxu1 }
 0x5e6   :  { %v689_v19 = vadd.f32 %v684_v33, %v1230_v0 }
 0x5e8   :  { %v1415_v34 = vadd.f32 %v1093_v32, %v689_v19 }
 0x5ea   :  { %v694_v35 = vsel %vm39_vm0, %v1415_v34, 0.0 }
 0x5eb   :  { %695 = vadd.xlane.f32.xlu0 %v694_v35  ;;  %v1059_v35 = vld [vmem:[%s1508_s7 + $0x20] sm:$0xff] }
 0x5ec   :  { %939 = vmatpush.bf16.msra.mxu3 %v1059_v35 }
 0x5ed   :  { %v686_v9 = vpop.f32.mrf.mxu1 }
 0x5ee   :  { %v690_v17 = vadd.f32 %v686_v9, %v1237_v2 }
 0x5f0   :  { %v1420_v5 = vadd.f32 %v1093_v32, %v690_v17 }
 0x5f2   :  { %v697_v36 = vsel %vm39_vm0, %v1420_v5, 0.0 }
 0x5f3   :  { %698 = vadd.xlane.f32.xlu1 %v697_v36 }
 0x65e   :  { %v696_v37 = vpop.xlane.xlu0 %695 }
 0x65f   :  { %v700_v38 = vmul.f32 %v696_v37, %v1241_v10 }
 0x661   :  { %v702_v0 = vsub.f32 %v1415_v34, %v700_v38 }
 0x663   :  { %v704_v39 = vmul.f32 %v702_v0, %v702_v0 }
 0x665   :  { %v706_v40 = vsel %vm39_vm0, %v704_v39, 0.0 }
 0x666   :  { %707 = vadd.xlane.f32.xlu2 %v706_v40  ;;  %v699_v41 = vpop.xlane.xlu1 %698 }
 0x667   :  { %v701_v42 = vmul.f32 %v699_v41, %v1241_v10 }
 0x669   :  { %v703_v2 = vsub.f32 %v1420_v5, %v701_v42 }
 0x66b   :  { %v705_v43 = vmul.f32 %v703_v2, %v703_v2 }
 0x66d   :  { %v709_v44 = vsel %vm39_vm0, %v705_v43, 0.0 }
 0x66e   :  { %710 = vadd.xlane.f32.xlu0 %v709_v44 }
 0x6d9   :  { %v708_v46 = vpop.xlane.xlu2 %707 }
 0x6da   :  { %v712_v1 = vmul.f32 %v708_v46, %v1241_v10 }
 0x6dc   :  { %v714_v47 = vadd.f32 1e-05, %v712_v1 }
 0x6de   :  { %1136 = vrsqrt.f32 %v714_v47  ;;  %vm722_vm14 = vweird.f32 %v714_v47 }
 0x6e1   :  { %v711_v49 = vpop.xlane.xlu0 %710 }
 0x6e2   :  { %v713_v50 = vmul.f32 %v711_v49, %v1241_v10  ;;  %v1094_v10 = vld [vmem:[%s1502_s1 + $0x2] ss:$0 sm:$0xff] }
 0x6e4   :  { %v1137_v51 = vpop.eup %1136  ;;  %v715_v52 = vadd.f32 1e-05, %v713_v50 }
 0x6e5   :  { %v717_v53 = vmul.f32 %v1137_v51, %v714_v47  ;;  %vm723_vm13 = vweird.f32 %v1137_v51 }
 0x6e6   :  { %1138 = vrsqrt.f32 %v715_v52  ;;  %vm724_vm15 = vmor %vm722_vm14, %vm723_vm13  ;;  %vm732_vm2 = vweird.f32 %v715_v52 }
 0x6e7   :  { %v718_v54 = vmul.f32 %v1137_v51, %v717_v53 }
 0x6e9   :  { %v719_v56 = vmul.f32 0.5, %v718_v54 }
 0x6eb   :  { %v720_v57 = vsub.f32 1.5, %v719_v56 }
 0x6ec   :  { %v1139_v58 = vpop.eup %1138 }
 0x6ed   :  { %v721_v59 = vmul.f32 %v1137_v51, %v720_v57  ;;  %v727_v62 = vmul.f32 %v1139_v58, %v715_v52  ;;  %vm733_vm1 = vweird.f32 %v1139_v58  ;;  %v1056_v52 = vld [vmem:[%s1508_s7 + $0x8] sm:$0xff] }
 0x6ee   :  { %vm734_vm3 = vmor %vm732_vm2, %vm733_vm1 }
 0x6ef   :  { %v728_v63 = vmul.f32 %v1139_v58, %v727_v62  ;;  %v725_v3 = vsel %vm724_vm15, %v1137_v51, %v721_v59  ;;  %v1055_v59 = vld [vmem:[%s1508_s7] sm:$0xff] }
 0x6f0   :  { %v736_v55 = vmul.f32 %v725_v3, %v702_v0  ;;  %v1058_v0 = vld [vmem:[%s1508_s7 + $0x18] sm:$0xff] }
 0x6f1   :  { %v729_v4 = vmul.f32 0.5, %v728_v63  ;;  %940 = vmatpush.bf16.msra.mxu3 %v1058_v0 }
 0x6f2   :  { %v739_v60 = vmul.f32 %v1094_v10, %v736_v55 }
 0x6f3   :  { %v730_v6 = vsub.f32 1.5, %v729_v4 }
 0x6f4   :  { %v742_v7 = vadd.f32 %v1095_v16, %v739_v60 }
 0x6f5   :  { %v731_v61 = vmul.f32 %v1139_v58, %v730_v6  ;;  %941 = vmatpush.bf16.msra.mxu3 %v1057_v45 }
 0x6f7   :  { %v735_v8 = vsel %vm734_vm3, %v1139_v58, %v731_v61 }
 0x6f8   :  { %v737_v12 = vmul.f32 %v735_v8, %v703_v2 }
 0x6f9   :  { %942 = vmatpush.bf16.msra.mxu3 %v1056_v52 }
 0x6fa   :  { %v740_v11 = vmul.f32 %v1094_v10, %v737_v12 }
 0x6fc   :  { %v743_v13 = vadd.f32 %v1095_v16, %v740_v11 }
 0x6fd   :  { %943 = vmatpush.bf16.msra.mxu3 %v1055_v59 }
 0x6fe   :  { %v744_v14 = vpack.c.bf16 %v743_v13, %v742_v7 }
 0x700   :  { %1014 = vmatmul.msk.bf16.vlgmr.msra.gmra.mxu2 %vm39_vm0, %v744_v14 }
 0x783   :  { %v777_v18 = vpop.f32.mrf.mxu2 }
 0x784   :  { %v1448_v20 = vadd.f32 %v1096_v15, %v777_v18 }
 0x786   :  { %v1454_v22 = vmul.f32 0.70710677, %v1448_v20 }
 0x788   :  { %v786_v23 = vmul.f32 %v1454_v22, %v1454_v22 }
 0x78a   :  { %v787_v25 = vmin.f32 %v786_v23, 16.0 }
 0x78b   :  { %v779_v26 = vpop.f32.mrf.mxu2 }
 0x78c   :  { %v788_v27 = vmul.f32 2.1237322e-06, %v787_v25  ;;  %v799_v28 = vmul.f32 3.8918573e-05, %v787_v25  ;;  %v1461_v29 = vadd.f32 %v1096_v15, %v779_v26 }
 0x78e   :  { %v789_v31 = vadd.f32 0.00028619796, %v788_v27  ;;  %v800_v32 = vadd.f32 0.001143296, %v799_v28  ;;  %v1467_v33 = vmul.f32 0.70710677, %v1461_v29 }
 0x790   :  { %v801_v19 = vmul.f32 %v800_v32, %v787_v25  ;;  %v826_v9 = vmul.f32 %v1467_v33, %v1467_v33  ;;  %v790_v17 = vmul.f32 %v789_v31, %v787_v25 }
 0x792   :  { %v802_v36 = vadd.f32 0.014752088, %v801_v19  ;;  %v827_v37 = vmin.f32 %v826_v9, 16.0  ;;  %v791_v41 = vadd.f32 0.0036580483, %v790_v17 }
 0x794   :  { %v803_v38 = vmul.f32 %v802_v36, %v787_v25  ;;  %v828_v39 = vmul.f32 2.1237322e-06, %v827_v37  ;;  %v839_v40 = vmul.f32 3.8918573e-05, %v827_v37  ;;  %v792_v47 = vmul.f32 %v791_v41, %v787_v25 }
 0x796   :  { %v804_v42 = vadd.f32 0.112945676, %v803_v38  ;;  %v829_v2 = vadd.f32 0.00028619796, %v828_v39  ;;  %v840_v43 = vadd.f32 0.001143296, %v839_v40 }
 0x797   :  { %v793_v54 = vadd.f32 0.05243302, %v792_v47 }
 0x798   :  { %v805_v44 = vmul.f32 %v804_v42, %v787_v25  ;;  %v830_v46 = vmul.f32 %v829_v2, %v827_v37  ;;  %v841_v1 = vmul.f32 %v840_v43, %v827_v37  ;;  %v782_v42 = vmul.f32 0.5, %v1448_v20 }
 0x799   :  { %v794_v63 = vmul.f32 %v793_v54, %v787_v25  ;;  %v783_v2 = vmul.f32 0.5, %v1461_v29 }
 0x79a   :  { %v806_v48 = vadd.f32 0.4994258, %v805_v44  ;;  %v831_v49 = vadd.f32 0.0036580483, %v830_v46  ;;  %v842_v50 = vadd.f32 0.014752088, %v841_v1 }
 0x79b   :  { %v795_v55 = vadd.f32 0.18741608, %v794_v63  ;;  %v1097_v1 = vld [vmem:[%s1502_s1 + $0x5] ss:$0 sm:$0xff]  ;;  %s1181_s1 = smov 128  }
 0x79c   :  { %v807_v51 = vmul.f32 %v806_v48, %v787_v25  ;;  %v843_v53 = vmul.f32 %v842_v50, %v827_v37  ;;  %v832_v57 = vmul.f32 %v831_v49, %v827_v37 }
 0x79d   :  { %v796_v12 = vmul.f32 %v795_v55, %v787_v25 }
 0x79e   :  { %v808_v56 = vadd.f32 1.0, %v807_v51  ;;  %v844_v58 = vadd.f32 0.112945676, %v843_v53  ;;  %v833_v3 = vadd.f32 0.05243302, %v832_v57 }
 0x79f   :  { %v797_v18 = vadd.f32 1.1283791, %v796_v12 }
 0x7a0   :  { %1140 = vrcp.f32 %v808_v56  ;;  %v845_v62 = vmul.f32 %v844_v58, %v827_v37  ;;  %v834_v8 = vmul.f32 %v833_v3, %v827_v37  ;;  %v820_v7 = vand.u32 2147483648, %v808_v56 }
 0x7a1   :  { %v818_v14 = vand.u32 2147483647, %v808_v56  ;;  %vm814_vm5 = vweird.f32 %v808_v56  ;;  %v798_v30 = vmul.f32 %v797_v18, %v1454_v22 }
 0x7a2   :  { %v846_v4 = vadd.f32 0.4994258, %v845_v62  ;;  %v835_v13 = vadd.f32 0.18741608, %v834_v8  ;;  %v821_v24 = vor.u32 1.1754944e-38, %v820_v7 }
 0x7a3   :  { %vm819_vm7 = vcmp.eq.f32.partialorder %v818_v14, 8.507059e+37 }
 0x7a4   :  { %v847_v6 = vmul.f32 %v846_v4, %v827_v37  ;;  %v836_v26 = vmul.f32 %v835_v13, %v827_v37 }
 0x7a6   :  { %v1141_v10 = vpop.eup %1140  ;;  %v848_v16 = vadd.f32 1.0, %v847_v6  ;;  %v837_v25 = vadd.f32 1.1283791, %v836_v26 }
 0x7a7   :  { %v810_v61 = vmul.f32 %v1141_v10, %v808_v56  ;;  %vm815_vm4 = vweird.f32 %v1141_v10 }
 0x7a8   :  { %1142 = vrcp.f32 %v848_v16  ;;  %vm816_vm6 = vmor %vm814_vm5, %vm815_vm4  ;;  %v860_v32 = vand.u32 2147483648, %v848_v16  ;;  %v858_v9 = vand.u32 2147483647, %v848_v16  ;;  %vm854_vm9 = vweird.f32 %v848_v16 }
 0x7a9   :  { %v811_v60 = vsub.f32 1.0, %v810_v61  ;;  %v838_v0 = vmul.f32 %v837_v25, %v1467_v33 }
 0x7aa   :  { %v861_v36 = vor.u32 1.1754944e-38, %v860_v32  ;;  %vm859_vm11 = vcmp.eq.f32.partialorder %v858_v9, 8.507059e+37 }
 0x7ab   :  { %v812_v11 = vmul.f32 %v1141_v10, %v811_v60 }
 0x7ad   :  { %v813_v15 = vadd.f32 %v1141_v10, %v812_v11 }
 0x7ae   :  { %v1143_v21 = vpop.eup %1142 }
 0x7af   :  { %v817_v23 = vsel %vm816_vm6, %v1141_v10, %v813_v15  ;;  %v850_v27 = vmul.f32 %v1143_v21, %v848_v16  ;;  %vm855_vm8 = vweird.f32 %v1143_v21 }
 0x7b0   :  { %v822_v28 = vsel %vm819_vm7, %v821_v24, %v817_v23  ;;  %vm856_vm10 = vmor %vm854_vm9, %vm855_vm8 }
 0x7b1   :  { %v851_v31 = vsub.f32 1.0, %v850_v27  ;;  %v823_v19 = vmul.f32 %v822_v28, %v798_v30 }
 0x7b3   :  { %v852_v35 = vmul.f32 %v1143_v21, %v851_v31  ;;  %v1015_v38 = vclamps-f32 %v823_v19, 1.0 }
 0x7b5   :  { %v853_v17 = vadd.f32 %v1143_v21, %v852_v35  ;;  %v866_v41 = vadd.f32 1.0, %v1015_v38 }
 0x7b7   :  { %v857_v37 = vsel %vm856_vm10, %v1143_v21, %v853_v17  ;;  %v868_v44 = vmul.f32 %v866_v41, %v782_v42 }
 0x7b8   :  { %v862_v39 = vsel %vm859_vm11, %v861_v36, %v857_v37 }
 0x7b9   :  { %v863_v40 = vmul.f32 %v862_v39, %v838_v0 }
 0x7bb   :  { %v1016_v22 = vclamps-f32 %v863_v40, 1.0 }
 0x7bd   :  { %v867_v43 = vadd.f32 1.0, %v1016_v22 }
 0x7bf   :  { %v869_v45 = vmul.f32 %v867_v43, %v783_v2 }
 0x7c1   :  { %v870_v46 = vpack.c.bf16 %v869_v45, %v868_v44 }
 0x7c3   :  { %944 = vmatmul.bf16.vlgmr.msra.gmra.mxu3 %v870_v46 }
 0x846   :  { %v945_v33 = vpop.f32.mrf.mxu3 }
 0x847   :  { %v946_v47 = vadd.f32 %v1097_v1, %v945_v33 }
 0x849   :  { %v950_v48 = vadd.f32 %v946_v47, %v1415_v34 }
 0x84b   :  { %952 = vst.msk [vmem:[#allocation2] sm:$0xff] %vm39_vm0, %v950_v48 }
 0x84e   :  { %v947_v20 = vpop.f32.mrf.mxu3 }
 0x84f   :  { %v948_v29 = vadd.f32 %v1097_v1, %v947_v20 }
 0x851   :  { %v951_v49 = vadd.f32 %v948_v29, %v1420_v5 }
 0x853   :  { %953 = vst.msk [vmem:[#allocation2 + $0x8] sm:$0xff] %vm39_vm0, %v951_v49 }
 0x854   :  { %966 = dma.vmem_to_hbm [thread:$0]  %s959_s30, 256, %s961_s6, [#allocation3], %s1181_s1, %s1181_s1, %s1178_s22  }
 0x855   :  { %1168 = dma.done.wait [#allocation3], 256  }
 0x856   :  { %1169 = vsyncadd [#allocation3], 4294967040 }
 0x857   :  { %971 = vsyncpa [#allocation3], 1 }

</bundles_post_ra>
